<compile_context>
chip_gen: v5e
topology: v5e:2x2
jax: 0.10.0
libtpu: 0.0.40
codegen_flags: <defaults>
</compile_context>

<pallas_src>
import jax
import jax.numpy as jnp
from jax import lax
from jax.experimental import pallas as pl
from jax.experimental.pallas import tpu as pltpu

N_FEAT = 16          # hidden width (true dims: 2 -> 16 -> 16 -> 2)
N_IN = 2             # input/output feature count of the ODE state
BIAS_COL = 16        # lane holding the bias inside the packed parameter slab
P_LANES = 128        # packed-parameter slab lane width (one vreg width)
MAX_BLK = 2048       # max lanes per grid step
SUB_CANDS = (512, 256, 128)   # in-kernel sub-tile widths (largest that divides blk wins)


def _round_up(n, m):
    return ((n + m - 1) // m) * m


def _make_kernel(blk, sub):
    """Build the per-batch-block kernel; blk/sub are static (multiples of 128, sub | blk)."""
    n_sub = blk // sub

    def kernel(p_ref, x_ref, o_ref):
        # Hoist all parameters out of the sub-tile loop (VMEM -> vregs once per block).
        w1 = p_ref[0, :, 0:N_IN]                        # (16, 2)   PyTorch (out, in) layout
        b1 = p_ref[0, :, BIAS_COL:BIAS_COL + 1]         # (16, 1)
        w2 = p_ref[1, :, 0:N_FEAT]                      # (16, 16)
        b2 = p_ref[1, :, BIAS_COL:BIAS_COL + 1]         # (16, 1)
        w3 = p_ref[2, 0:N_IN, 0:N_FEAT]                 # (2, 16)   only the real output rows
        b3 = p_ref[2, 0:N_IN, BIAS_COL:BIAS_COL + 1]    # (2, 1)

        def tile(xs):                                   # xs: (2, sub) f32, batch on lanes
            # layer 0: fan-in 2 (specialized) + ReLU
            h = jnp.maximum(w1[:, 0:1] * xs[0:1, :] + w1[:, 1:2] * xs[1:2, :] + b1, 0.0)
            # layer 1: fan-in 16 + ReLU (unrolled VPU broadcast-FMAs)
            acc = w2[:, 0:1] * h[0:1, :]
            for i in range(1, N_FEAT):
                acc = acc + w2[:, i:i + 1] * h[i:i + 1, :]
            h = jnp.maximum(acc + b2, 0.0)
            # layer 2: fan-in 16, 2 real output rows, no activation
            acc = w3[:, 0:1] * h[0:1, :]
            for i in range(1, N_FEAT):
                acc = acc + w3[:, i:i + 1] * h[i:i + 1, :]
            return acc + b3                             # (2, sub)

        if n_sub == 1:
            o_ref[...] = tile(x_ref[...]).astype(o_ref.dtype)
        else:
            def body(j, carry):
                off = pl.multiple_of(j * sub, 128)
                o_ref[:, pl.ds(off, sub)] = tile(
                    x_ref[:, pl.ds(off, sub)]).astype(o_ref.dtype)
                return carry

            lax.fori_loop(0, n_sub, body, 0, unroll=True)

    return kernel


@jax.jit
def neural_ode_func(t, x, packed_params):
    """Pallas equivalent of NeuralODEFunc.forward(t, x) = net(x).  x: (B, 2) f32."""
    del t                                               # unused, as in the reference module
    B = x.shape[0]
    b128 = _round_up(B, 128)
    # Blocks up to 2048 lanes, chosen so moderate batches give >= 2 "parallel" grid steps
    # (v7x megacore); small batches collapse to a single 128-lane block.
    blk = min(MAX_BLK, max(128, _round_up(b128 // 2, 128)))
    b_pad = _round_up(b128, blk)
    n_blocks = b_pad // blk
    sub = next(c for c in SUB_CANDS if blk % c == 0)    # in-kernel sub-tile width

    # Batch -> lanes; only the 2 real feature rows are materialized / DMA'd.
    xt = jnp.zeros((N_IN, b_pad), jnp.float32).at[:, :B].set(x.T)

    # 3-deep state pipelining only pays (and only makes sense) with more than one grid step.
    state_kwargs = {"pipeline_mode": pl.Buffered(3)} if n_blocks > 1 else {}

    out = pl.pallas_call(
        _make_kernel(blk, sub),
        out_shape=jax.ShapeDtypeStruct((N_IN, b_pad), jnp.float32),
        grid=(n_blocks,),
        in_specs=[
            # packed params: whole slab, one DMA, VMEM-resident across the grid
            pl.BlockSpec(memory_space=pltpu.MemorySpace.VMEM),
            # state block, lane-dense, 2 real rows only
            pl.BlockSpec((N_IN, blk), lambda i: (0, i), **state_kwargs),
        ],
        out_specs=pl.BlockSpec((N_IN, blk), lambda i: (0, i)),
        compiler_params=pltpu.CompilerParams(
            dimension_semantics=("parallel",)),
    )(packed_params, xt)

    return out[:, :B].T                                 # back to PyTorch layout (B, 2)


def pack_params(w1, b1, w2, b2, w3, b3):
    """Pack all Linear params (PyTorch (out,in)/(out,) layout) into one zero-padded
    (3, 16, 128) slab: lanes 0..in_f-1 hold W, lane 16 holds the bias."""
    p = jnp.zeros((3, N_FEAT, P_LANES), jnp.float32)
    p = p.at[0, :16, :2].set(w1).at[0, :16, BIAS_COL].set(b1)
    p = p.at[1, :16, :16].set(w2).at[1, :16, BIAS_COL].set(b2)
    p = p.at[2, :2, :16].set(w3).at[2, :2, BIAS_COL].set(b3)
    return p


def init_params(key):
    """nn.Linear-style init: U(-1/sqrt(fan_in), 1/sqrt(fan_in)), (out, in) layout."""
    dims = [(16, 2), (16, 16), (2, 16)]
    params = []
    for fan_out, fan_in in dims:
        key, kw, kb = jax.random.split(key, 3)
        bound = 1.0 / (fan_in ** 0.5)
        params.append(jax.random.uniform(kw, (fan_out, fan_in), jnp.float32, -bound, bound))
        params.append(jax.random.uniform(kb, (fan_out,), jnp.float32, -bound, bound))
    return tuple(params)


def reference_forward(x, raw_params):
    """Pure-JAX reference matching the PyTorch module."""
    w1, b1, w2, b2, w3, b3 = raw_params
    h1 = jnp.maximum(x @ w1.T + b1, 0.0)
    h2 = jnp.maximum(h1 @ w2.T + b2, 0.0)
    return h2 @ w3.T + b3


if __name__ == "__main__":
    key = jax.random.PRNGKey(0)
    key, kx1, kx2 = jax.random.split(key, 3)
    raw = init_params(key)
    packed = pack_params(*raw)                 # done once at "model init" time
    t = jnp.float32(0.0)

    # Small batch (Van der Pol states (x, v)): single 128-lane block, no sub-tiling.
    x_small = jax.random.normal(kx1, (8, 2), jnp.float32)
    out_small = jax.block_until_ready(neural_ode_func(t, x_small, packed))
    ref_small = reference_forward(x_small, raw)
    assert out_small.shape == (8, 2) and out_small.dtype == jnp.float32
    assert jnp.allclose(out_small, ref_small, atol=1e-5, rtol=1e-5)

    # Moderate batch: 2 "parallel" grid steps, Buffered(3) state pipelining, and the
    # in-kernel sub-tile loop (blk=384 -> three 128-lane sub-tiles).
    x_big = jax.random.normal(kx2, (640, 2), jnp.float32)
    out_big = jax.block_until_ready(neural_ode_func(t, x_big, packed))
    ref_big = reference_forward(x_big, raw)
    assert out_big.shape == (640, 2) and out_big.dtype == jnp.float32
    assert jnp.allclose(out_big, ref_big, atol=1e-5, rtol=1e-5)

    print("KERNEL_OK")
</pallas_src>

<mosaic_0001>
module attributes {stable_mosaic.version = 11 : i64} {
  func.func @kernel(%arg0: i32, %arg1: memref<3x16x128xf32, #tpu.memory_space<vmem>>, %arg2: memref<2x128xf32, #tpu.memory_space<vmem>>, %arg3: memref<2x128xf32, #tpu.memory_space<vmem>>) attributes {dimension_semantics = [#tpu.dimension_semantics<parallel>], iteration_bounds = array<i64: 1>, scalar_prefetch = 0 : i64, scratch_operands = 0 : i64, tpu.core_type = #tpu.core_type<tc>, window_params = [{pipeline_mode = #tpu.pipeline_mode<synchronous>, transform_indices = @transform_0, window_bounds = array<i64: 3, 16, 128>}, {transform_indices = @transform_1, window_bounds = array<i64: 2, 128>}, {transform_indices = @transform_2, window_bounds = array<i64: 2, 128>}]} {
    %c0 = arith.constant 0 : index
    %c0_0 = arith.constant 0 : index
    %c0_1 = arith.constant 0 : index
    %0 = vector.load %arg1[%c0, %c0_0, %c0_1] : memref<3x16x128xf32, #tpu.memory_space<vmem>>, vector<1x16x2xf32>
    %1 = vector.shape_cast %0 : vector<1x16x2xf32> to vector<16x2xf32>
    %c0_2 = arith.constant 0 : index
    %c0_3 = arith.constant 0 : index
    %c16 = arith.constant 16 : index
    %2 = vector.load %arg1[%c0_2, %c0_3, %c16] : memref<3x16x128xf32, #tpu.memory_space<vmem>>, vector<1x16x1xf32>
    %3 = vector.shape_cast %2 : vector<1x16x1xf32> to vector<16x1xf32>
    %c1 = arith.constant 1 : index
    %c0_4 = arith.constant 0 : index
    %c0_5 = arith.constant 0 : index
    %4 = vector.load %arg1[%c1, %c0_4, %c0_5] : memref<3x16x128xf32, #tpu.memory_space<vmem>>, vector<1x16x16xf32>
    %5 = vector.shape_cast %4 : vector<1x16x16xf32> to vector<16x16xf32>
    %c1_6 = arith.constant 1 : index
    %c0_7 = arith.constant 0 : index
    %c16_8 = arith.constant 16 : index
    %6 = vector.load %arg1[%c1_6, %c0_7, %c16_8] : memref<3x16x128xf32, #tpu.memory_space<vmem>>, vector<1x16x1xf32>
    %7 = vector.shape_cast %6 : vector<1x16x1xf32> to vector<16x1xf32>
    %c2 = arith.constant 2 : index
    %c0_9 = arith.constant 0 : index
    %c0_10 = arith.constant 0 : index
    %8 = vector.load %arg1[%c2, %c0_9, %c0_10] : memref<3x16x128xf32, #tpu.memory_space<vmem>>, vector<1x2x16xf32>
    %9 = vector.shape_cast %8 : vector<1x2x16xf32> to vector<2x16xf32>
    %c2_11 = arith.constant 2 : index
    %c0_12 = arith.constant 0 : index
    %c16_13 = arith.constant 16 : index
    %10 = vector.load %arg1[%c2_11, %c0_12, %c16_13] : memref<3x16x128xf32, #tpu.memory_space<vmem>>, vector<1x2x1xf32>
    %11 = vector.shape_cast %10 : vector<1x2x1xf32> to vector<2x1xf32>
    %c0_14 = arith.constant 0 : index
    %c0_15 = arith.constant 0 : index
    %12 = vector.load %arg2[%c0_14, %c0_15] : memref<2x128xf32, #tpu.memory_space<vmem>>, vector<2x128xf32>
    %13 = vector.extract_strided_slice %1 {offsets = [0, 0], sizes = [16, 1], strides = [1, 1]} : vector<16x2xf32> to vector<16x1xf32>
    %14 = vector.extract_strided_slice %12 {offsets = [0, 0], sizes = [1, 128], strides = [1, 1]} : vector<2x128xf32> to vector<1x128xf32>
    %15 = vector.broadcast %13 : vector<16x1xf32> to vector<16x128xf32>
    %16 = vector.broadcast %14 : vector<1x128xf32> to vector<16x128xf32>
    %17 = arith.mulf %15, %16 : vector<16x128xf32>
    %18 = vector.extract_strided_slice %1 {offsets = [0, 1], sizes = [16, 1], strides = [1, 1]} : vector<16x2xf32> to vector<16x1xf32>
    %19 = vector.extract_strided_slice %12 {offsets = [1, 0], sizes = [1, 128], strides = [1, 1]} : vector<2x128xf32> to vector<1x128xf32>
    %20 = vector.broadcast %18 : vector<16x1xf32> to vector<16x128xf32>
    %21 = vector.broadcast %19 : vector<1x128xf32> to vector<16x128xf32>
    %22 = arith.mulf %20, %21 : vector<16x128xf32>
    %23 = arith.addf %17, %22 : vector<16x128xf32>
    %24 = vector.broadcast %3 : vector<16x1xf32> to vector<16x128xf32>
    %25 = arith.addf %23, %24 : vector<16x128xf32>
    %cst = arith.constant 0.000000e+00 : f32
    %26 = vector.broadcast %cst : f32 to vector<16x128xf32>
    %27 = arith.maximumf %25, %26 : vector<16x128xf32>
    %28 = vector.extract_strided_slice %5 {offsets = [0, 0], sizes = [16, 1], strides = [1, 1]} : vector<16x16xf32> to vector<16x1xf32>
    %29 = vector.extract_strided_slice %27 {offsets = [0, 0], sizes = [1, 128], strides = [1, 1]} : vector<16x128xf32> to vector<1x128xf32>
    %30 = vector.broadcast %28 : vector<16x1xf32> to vector<16x128xf32>
    %31 = vector.broadcast %29 : vector<1x128xf32> to vector<16x128xf32>
    %32 = arith.mulf %30, %31 : vector<16x128xf32>
    %33 = vector.extract_strided_slice %5 {offsets = [0, 1], sizes = [16, 1], strides = [1, 1]} : vector<16x16xf32> to vector<16x1xf32>
    %34 = vector.extract_strided_slice %27 {offsets = [1, 0], sizes = [1, 128], strides = [1, 1]} : vector<16x128xf32> to vector<1x128xf32>
    %35 = vector.broadcast %33 : vector<16x1xf32> to vector<16x128xf32>
    %36 = vector.broadcast %34 : vector<1x128xf32> to vector<16x128xf32>
    %37 = arith.mulf %35, %36 : vector<16x128xf32>
    %38 = arith.addf %32, %37 : vector<16x128xf32>
    %39 = vector.extract_strided_slice %5 {offsets = [0, 2], sizes = [16, 1], strides = [1, 1]} : vector<16x16xf32> to vector<16x1xf32>
    %40 = vector.extract_strided_slice %27 {offsets = [2, 0], sizes = [1, 128], strides = [1, 1]} : vector<16x128xf32> to vector<1x128xf32>
    %41 = vector.broadcast %39 : vector<16x1xf32> to vector<16x128xf32>
    %42 = vector.broadcast %40 : vector<1x128xf32> to vector<16x128xf32>
    %43 = arith.mulf %41, %42 : vector<16x128xf32>
    %44 = arith.addf %38, %43 : vector<16x128xf32>
    %45 = vector.extract_strided_slice %5 {offsets = [0, 3], sizes = [16, 1], strides = [1, 1]} : vector<16x16xf32> to vector<16x1xf32>
    %46 = vector.extract_strided_slice %27 {offsets = [3, 0], sizes = [1, 128], strides = [1, 1]} : vector<16x128xf32> to vector<1x128xf32>
    %47 = vector.broadcast %45 : vector<16x1xf32> to vector<16x128xf32>
    %48 = vector.broadcast %46 : vector<1x128xf32> to vector<16x128xf32>
    %49 = arith.mulf %47, %48 : vector<16x128xf32>
    %50 = arith.addf %44, %49 : vector<16x128xf32>
    %51 = vector.extract_strided_slice %5 {offsets = [0, 4], sizes = [16, 1], strides = [1, 1]} : vector<16x16xf32> to vector<16x1xf32>
    %52 = vector.extract_strided_slice %27 {offsets = [4, 0], sizes = [1, 128], strides = [1, 1]} : vector<16x128xf32> to vector<1x128xf32>
    %53 = vector.broadcast %51 : vector<16x1xf32> to vector<16x128xf32>
    %54 = vector.broadcast %52 : vector<1x128xf32> to vector<16x128xf32>
    %55 = arith.mulf %53, %54 : vector<16x128xf32>
    %56 = arith.addf %50, %55 : vector<16x128xf32>
    %57 = vector.extract_strided_slice %5 {offsets = [0, 5], sizes = [16, 1], strides = [1, 1]} : vector<16x16xf32> to vector<16x1xf32>
    %58 = vector.extract_strided_slice %27 {offsets = [5, 0], sizes = [1, 128], strides = [1, 1]} : vector<16x128xf32> to vector<1x128xf32>
    %59 = vector.broadcast %57 : vector<16x1xf32> to vector<16x128xf32>
    %60 = vector.broadcast %58 : vector<1x128xf32> to vector<16x128xf32>
    %61 = arith.mulf %59, %60 : vector<16x128xf32>
    %62 = arith.addf %56, %61 : vector<16x128xf32>
    %63 = vector.extract_strided_slice %5 {offsets = [0, 6], sizes = [16, 1], strides = [1, 1]} : vector<16x16xf32> to vector<16x1xf32>
    %64 = vector.extract_strided_slice %27 {offsets = [6, 0], sizes = [1, 128], strides = [1, 1]} : vector<16x128xf32> to vector<1x128xf32>
    %65 = vector.broadcast %63 : vector<16x1xf32> to vector<16x128xf32>
    %66 = vector.broadcast %64 : vector<1x128xf32> to vector<16x128xf32>
    %67 = arith.mulf %65, %66 : vector<16x128xf32>
    %68 = arith.addf %62, %67 : vector<16x128xf32>
    %69 = vector.extract_strided_slice %5 {offsets = [0, 7], sizes = [16, 1], strides = [1, 1]} : vector<16x16xf32> to vector<16x1xf32>
    %70 = vector.extract_strided_slice %27 {offsets = [7, 0], sizes = [1, 128], strides = [1, 1]} : vector<16x128xf32> to vector<1x128xf32>
    %71 = vector.broadcast %69 : vector<16x1xf32> to vector<16x128xf32>
    %72 = vector.broadcast %70 : vector<1x128xf32> to vector<16x128xf32>
    %73 = arith.mulf %71, %72 : vector<16x128xf32>
    %74 = arith.addf %68, %73 : vector<16x128xf32>
    %75 = vector.extract_strided_slice %5 {offsets = [0, 8], sizes = [16, 1], strides = [1, 1]} : vector<16x16xf32> to vector<16x1xf32>
    %76 = vector.extract_strided_slice %27 {offsets = [8, 0], sizes = [1, 128], strides = [1, 1]} : vector<16x128xf32> to vector<1x128xf32>
    %77 = vector.broadcast %75 : vector<16x1xf32> to vector<16x128xf32>
    %78 = vector.broadcast %76 : vector<1x128xf32> to vector<16x128xf32>
    %79 = arith.mulf %77, %78 : vector<16x128xf32>
    %80 = arith.addf %74, %79 : vector<16x128xf32>
    %81 = vector.extract_strided_slice %5 {offsets = [0, 9], sizes = [16, 1], strides = [1, 1]} : vector<16x16xf32> to vector<16x1xf32>
    %82 = vector.extract_strided_slice %27 {offsets = [9, 0], sizes = [1, 128], strides = [1, 1]} : vector<16x128xf32> to vector<1x128xf32>
    %83 = vector.broadcast %81 : vector<16x1xf32> to vector<16x128xf32>
    %84 = vector.broadcast %82 : vector<1x128xf32> to vector<16x128xf32>
    %85 = arith.mulf %83, %84 : vector<16x128xf32>
    %86 = arith.addf %80, %85 : vector<16x128xf32>
    %87 = vector.extract_strided_slice %5 {offsets = [0, 10], sizes = [16, 1], strides = [1, 1]} : vector<16x16xf32> to vector<16x1xf32>
    %88 = vector.extract_strided_slice %27 {offsets = [10, 0], sizes = [1, 128], strides = [1, 1]} : vector<16x128xf32> to vector<1x128xf32>
    %89 = vector.broadcast %87 : vector<16x1xf32> to vector<16x128xf32>
    %90 = vector.broadcast %88 : vector<1x128xf32> to vector<16x128xf32>
    %91 = arith.mulf %89, %90 : vector<16x128xf32>
    %92 = arith.addf %86, %91 : vector<16x128xf32>
    %93 = vector.extract_strided_slice %5 {offsets = [0, 11], sizes = [16, 1], strides = [1, 1]} : vector<16x16xf32> to vector<16x1xf32>
    %94 = vector.extract_strided_slice %27 {offsets = [11, 0], sizes = [1, 128], strides = [1, 1]} : vector<16x128xf32> to vector<1x128xf32>
    %95 = vector.broadcast %93 : vector<16x1xf32> to vector<16x128xf32>
    %96 = vector.broadcast %94 : vector<1x128xf32> to vector<16x128xf32>
    %97 = arith.mulf %95, %96 : vector<16x128xf32>
    %98 = arith.addf %92, %97 : vector<16x128xf32>
    %99 = vector.extract_strided_slice %5 {offsets = [0, 12], sizes = [16, 1], strides = [1, 1]} : vector<16x16xf32> to vector<16x1xf32>
    %100 = vector.extract_strided_slice %27 {offsets = [12, 0], sizes = [1, 128], strides = [1, 1]} : vector<16x128xf32> to vector<1x128xf32>
    %101 = vector.broadcast %99 : vector<16x1xf32> to vector<16x128xf32>
    %102 = vector.broadcast %100 : vector<1x128xf32> to vector<16x128xf32>
    %103 = arith.mulf %101, %102 : vector<16x128xf32>
    %104 = arith.addf %98, %103 : vector<16x128xf32>
    %105 = vector.extract_strided_slice %5 {offsets = [0, 13], sizes = [16, 1], strides = [1, 1]} : vector<16x16xf32> to vector<16x1xf32>
    %106 = vector.extract_strided_slice %27 {offsets = [13, 0], sizes = [1, 128], strides = [1, 1]} : vector<16x128xf32> to vector<1x128xf32>
    %107 = vector.broadcast %105 : vector<16x1xf32> to vector<16x128xf32>
    %108 = vector.broadcast %106 : vector<1x128xf32> to vector<16x128xf32>
    %109 = arith.mulf %107, %108 : vector<16x128xf32>
    %110 = arith.addf %104, %109 : vector<16x128xf32>
    %111 = vector.extract_strided_slice %5 {offsets = [0, 14], sizes = [16, 1], strides = [1, 1]} : vector<16x16xf32> to vector<16x1xf32>
    %112 = vector.extract_strided_slice %27 {offsets = [14, 0], sizes = [1, 128], strides = [1, 1]} : vector<16x128xf32> to vector<1x128xf32>
    %113 = vector.broadcast %111 : vector<16x1xf32> to vector<16x128xf32>
    %114 = vector.broadcast %112 : vector<1x128xf32> to vector<16x128xf32>
    %115 = arith.mulf %113, %114 : vector<16x128xf32>
    %116 = arith.addf %110, %115 : vector<16x128xf32>
    %117 = vector.extract_strided_slice %5 {offsets = [0, 15], sizes = [16, 1], strides = [1, 1]} : vector<16x16xf32> to vector<16x1xf32>
    %118 = vector.extract_strided_slice %27 {offsets = [15, 0], sizes = [1, 128], strides = [1, 1]} : vector<16x128xf32> to vector<1x128xf32>
    %119 = vector.broadcast %117 : vector<16x1xf32> to vector<16x128xf32>
    %120 = vector.broadcast %118 : vector<1x128xf32> to vector<16x128xf32>
    %121 = arith.mulf %119, %120 : vector<16x128xf32>
    %122 = arith.addf %116, %121 : vector<16x128xf32>
    %123 = vector.broadcast %7 : vector<16x1xf32> to vector<16x128xf32>
    %124 = arith.addf %122, %123 : vector<16x128xf32>
    %cst_16 = arith.constant 0.000000e+00 : f32
    %125 = vector.broadcast %cst_16 : f32 to vector<16x128xf32>
    %126 = arith.maximumf %124, %125 : vector<16x128xf32>
    %127 = vector.extract_strided_slice %9 {offsets = [0, 0], sizes = [2, 1], strides = [1, 1]} : vector<2x16xf32> to vector<2x1xf32>
    %128 = vector.extract_strided_slice %126 {offsets = [0, 0], sizes = [1, 128], strides = [1, 1]} : vector<16x128xf32> to vector<1x128xf32>
    %129 = vector.broadcast %127 : vector<2x1xf32> to vector<2x128xf32>
    %130 = vector.broadcast %128 : vector<1x128xf32> to vector<2x128xf32>
    %131 = arith.mulf %129, %130 : vector<2x128xf32>
    %132 = vector.extract_strided_slice %9 {offsets = [0, 1], sizes = [2, 1], strides = [1, 1]} : vector<2x16xf32> to vector<2x1xf32>
    %133 = vector.extract_strided_slice %126 {offsets = [1, 0], sizes = [1, 128], strides = [1, 1]} : vector<16x128xf32> to vector<1x128xf32>
    %134 = vector.broadcast %132 : vector<2x1xf32> to vector<2x128xf32>
    %135 = vector.broadcast %133 : vector<1x128xf32> to vector<2x128xf32>
    %136 = arith.mulf %134, %135 : vector<2x128xf32>
    %137 = arith.addf %131, %136 : vector<2x128xf32>
    %138 = vector.extract_strided_slice %9 {offsets = [0, 2], sizes = [2, 1], strides = [1, 1]} : vector<2x16xf32> to vector<2x1xf32>
    %139 = vector.extract_strided_slice %126 {offsets = [2, 0], sizes = [1, 128], strides = [1, 1]} : vector<16x128xf32> to vector<1x128xf32>
    %140 = vector.broadcast %138 : vector<2x1xf32> to vector<2x128xf32>
    %141 = vector.broadcast %139 : vector<1x128xf32> to vector<2x128xf32>
    %142 = arith.mulf %140, %141 : vector<2x128xf32>
    %143 = arith.addf %137, %142 : vector<2x128xf32>
    %144 = vector.extract_strided_slice %9 {offsets = [0, 3], sizes = [2, 1], strides = [1, 1]} : vector<2x16xf32> to vector<2x1xf32>
    %145 = vector.extract_strided_slice %126 {offsets = [3, 0], sizes = [1, 128], strides = [1, 1]} : vector<16x128xf32> to vector<1x128xf32>
    %146 = vector.broadcast %144 : vector<2x1xf32> to vector<2x128xf32>
    %147 = vector.broadcast %145 : vector<1x128xf32> to vector<2x128xf32>
    %148 = arith.mulf %146, %147 : vector<2x128xf32>
    %149 = arith.addf %143, %148 : vector<2x128xf32>
    %150 = vector.extract_strided_slice %9 {offsets = [0, 4], sizes = [2, 1], strides = [1, 1]} : vector<2x16xf32> to vector<2x1xf32>
    %151 = vector.extract_strided_slice %126 {offsets = [4, 0], sizes = [1, 128], strides = [1, 1]} : vector<16x128xf32> to vector<1x128xf32>
    %152 = vector.broadcast %150 : vector<2x1xf32> to vector<2x128xf32>
    %153 = vector.broadcast %151 : vector<1x128xf32> to vector<2x128xf32>
    %154 = arith.mulf %152, %153 : vector<2x128xf32>
    %155 = arith.addf %149, %154 : vector<2x128xf32>
    %156 = vector.extract_strided_slice %9 {offsets = [0, 5], sizes = [2, 1], strides = [1, 1]} : vector<2x16xf32> to vector<2x1xf32>
    %157 = vector.extract_strided_slice %126 {offsets = [5, 0], sizes = [1, 128], strides = [1, 1]} : vector<16x128xf32> to vector<1x128xf32>
    %158 = vector.broadcast %156 : vector<2x1xf32> to vector<2x128xf32>
    %159 = vector.broadcast %157 : vector<1x128xf32> to vector<2x128xf32>
    %160 = arith.mulf %158, %159 : vector<2x128xf32>
    %161 = arith.addf %155, %160 : vector<2x128xf32>
    %162 = vector.extract_strided_slice %9 {offsets = [0, 6], sizes = [2, 1], strides = [1, 1]} : vector<2x16xf32> to vector<2x1xf32>
    %163 = vector.extract_strided_slice %126 {offsets = [6, 0], sizes = [1, 128], strides = [1, 1]} : vector<16x128xf32> to vector<1x128xf32>
    %164 = vector.broadcast %162 : vector<2x1xf32> to vector<2x128xf32>
    %165 = vector.broadcast %163 : vector<1x128xf32> to vector<2x128xf32>
    %166 = arith.mulf %164, %165 : vector<2x128xf32>
    %167 = arith.addf %161, %166 : vector<2x128xf32>
    %168 = vector.extract_strided_slice %9 {offsets = [0, 7], sizes = [2, 1], strides = [1, 1]} : vector<2x16xf32> to vector<2x1xf32>
    %169 = vector.extract_strided_slice %126 {offsets = [7, 0], sizes = [1, 128], strides = [1, 1]} : vector<16x128xf32> to vector<1x128xf32>
    %170 = vector.broadcast %168 : vector<2x1xf32> to vector<2x128xf32>
    %171 = vector.broadcast %169 : vector<1x128xf32> to vector<2x128xf32>
    %172 = arith.mulf %170, %171 : vector<2x128xf32>
    %173 = arith.addf %167, %172 : vector<2x128xf32>
    %174 = vector.extract_strided_slice %9 {offsets = [0, 8], sizes = [2, 1], strides = [1, 1]} : vector<2x16xf32> to vector<2x1xf32>
    %175 = vector.extract_strided_slice %126 {offsets = [8, 0], sizes = [1, 128], strides = [1, 1]} : vector<16x128xf32> to vector<1x128xf32>
    %176 = vector.broadcast %174 : vector<2x1xf32> to vector<2x128xf32>
    %177 = vector.broadcast %175 : vector<1x128xf32> to vector<2x128xf32>
    %178 = arith.mulf %176, %177 : vector<2x128xf32>
    %179 = arith.addf %173, %178 : vector<2x128xf32>
    %180 = vector.extract_strided_slice %9 {offsets = [0, 9], sizes = [2, 1], strides = [1, 1]} : vector<2x16xf32> to vector<2x1xf32>
    %181 = vector.extract_strided_slice %126 {offsets = [9, 0], sizes = [1, 128], strides = [1, 1]} : vector<16x128xf32> to vector<1x128xf32>
    %182 = vector.broadcast %180 : vector<2x1xf32> to vector<2x128xf32>
    %183 = vector.broadcast %181 : vector<1x128xf32> to vector<2x128xf32>
    %184 = arith.mulf %182, %183 : vector<2x128xf32>
    %185 = arith.addf %179, %184 : vector<2x128xf32>
    %186 = vector.extract_strided_slice %9 {offsets = [0, 10], sizes = [2, 1], strides = [1, 1]} : vector<2x16xf32> to vector<2x1xf32>
    %187 = vector.extract_strided_slice %126 {offsets = [10, 0], sizes = [1, 128], strides = [1, 1]} : vector<16x128xf32> to vector<1x128xf32>
    %188 = vector.broadcast %186 : vector<2x1xf32> to vector<2x128xf32>
    %189 = vector.broadcast %187 : vector<1x128xf32> to vector<2x128xf32>
    %190 = arith.mulf %188, %189 : vector<2x128xf32>
    %191 = arith.addf %185, %190 : vector<2x128xf32>
    %192 = vector.extract_strided_slice %9 {offsets = [0, 11], sizes = [2, 1], strides = [1, 1]} : vector<2x16xf32> to vector<2x1xf32>
    %193 = vector.extract_strided_slice %126 {offsets = [11, 0], sizes = [1, 128], strides = [1, 1]} : vector<16x128xf32> to vector<1x128xf32>
    %194 = vector.broadcast %192 : vector<2x1xf32> to vector<2x128xf32>
    %195 = vector.broadcast %193 : vector<1x128xf32> to vector<2x128xf32>
    %196 = arith.mulf %194, %195 : vector<2x128xf32>
    %197 = arith.addf %191, %196 : vector<2x128xf32>
    %198 = vector.extract_strided_slice %9 {offsets = [0, 12], sizes = [2, 1], strides = [1, 1]} : vector<2x16xf32> to vector<2x1xf32>
    %199 = vector.extract_strided_slice %126 {offsets = [12, 0], sizes = [1, 128], strides = [1, 1]} : vector<16x128xf32> to vector<1x128xf32>
    %200 = vector.broadcast %198 : vector<2x1xf32> to vector<2x128xf32>
    %201 = vector.broadcast %199 : vector<1x128xf32> to vector<2x128xf32>
    %202 = arith.mulf %200, %201 : vector<2x128xf32>
    %203 = arith.addf %197, %202 : vector<2x128xf32>
    %204 = vector.extract_strided_slice %9 {offsets = [0, 13], sizes = [2, 1], strides = [1, 1]} : vector<2x16xf32> to vector<2x1xf32>
    %205 = vector.extract_strided_slice %126 {offsets = [13, 0], sizes = [1, 128], strides = [1, 1]} : vector<16x128xf32> to vector<1x128xf32>
    %206 = vector.broadcast %204 : vector<2x1xf32> to vector<2x128xf32>
    %207 = vector.broadcast %205 : vector<1x128xf32> to vector<2x128xf32>
    %208 = arith.mulf %206, %207 : vector<2x128xf32>
    %209 = arith.addf %203, %208 : vector<2x128xf32>
    %210 = vector.extract_strided_slice %9 {offsets = [0, 14], sizes = [2, 1], strides = [1, 1]} : vector<2x16xf32> to vector<2x1xf32>
    %211 = vector.extract_strided_slice %126 {offsets = [14, 0], sizes = [1, 128], strides = [1, 1]} : vector<16x128xf32> to vector<1x128xf32>
    %212 = vector.broadcast %210 : vector<2x1xf32> to vector<2x128xf32>
    %213 = vector.broadcast %211 : vector<1x128xf32> to vector<2x128xf32>
    %214 = arith.mulf %212, %213 : vector<2x128xf32>
    %215 = arith.addf %209, %214 : vector<2x128xf32>
    %216 = vector.extract_strided_slice %9 {offsets = [0, 15], sizes = [2, 1], strides = [1, 1]} : vector<2x16xf32> to vector<2x1xf32>
    %217 = vector.extract_strided_slice %126 {offsets = [15, 0], sizes = [1, 128], strides = [1, 1]} : vector<16x128xf32> to vector<1x128xf32>
    %218 = vector.broadcast %216 : vector<2x1xf32> to vector<2x128xf32>
    %219 = vector.broadcast %217 : vector<1x128xf32> to vector<2x128xf32>
    %220 = arith.mulf %218, %219 : vector<2x128xf32>
    %221 = arith.addf %215, %220 : vector<2x128xf32>
    %222 = vector.broadcast %11 : vector<2x1xf32> to vector<2x128xf32>
    %223 = arith.addf %221, %222 : vector<2x128xf32>
    %c0_17 = arith.constant 0 : index
    %c0_18 = arith.constant 0 : index
    %224 = vector.load %arg3[%c0_17, %c0_18] : memref<2x128xf32, #tpu.memory_space<vmem>>, vector<2x128xf32>
    tpu.vector_store %arg3[%c0_17, %c0_18], %223 {strides = array<i32>} : memref<2x128xf32, #tpu.memory_space<vmem>>, vector<2x128xf32>,
    return
  }
  func.func @transform_0(%arg0: i32) -> (i32, i32, i32) {
    %c0_i32 = arith.constant 0 : i32
    %c0_i32_0 = arith.constant 0 : i32
    %c0_i32_1 = arith.constant 0 : i32
    %c0_i32_2 = arith.constant 0 : i32
    return %c0_i32, %c0_i32_0, %c0_i32_1 : i32, i32, i32
  }
  func.func @transform_1(%arg0: i32) -> (i32, i32) {
    %c0_i32 = arith.constant 0 : i32
    %c0_i32_0 = arith.constant 0 : i32
    return %c0_i32, %arg0 : i32, i32
  }
  func.func @transform_2(%arg0: i32) -> (i32, i32) {
    %c0_i32 = arith.constant 0 : i32
    %c0_i32_0 = arith.constant 0 : i32
    return %c0_i32, %arg0 : i32, i32
  }
}

</mosaic_0001>

<bundles_post_ra>
// kernel: neural_ode_func.1
= control target key start
LH: loop header
LB: loop body
LE: loop exit
PB: predicated region body
PF: predicated region fallthrough
CT: control target
= control target key end

     0   :  { %7 = vsyncpa [#allocation3], 0  ;;  %s516_s12 = smov [#allocation2]   ;;  %s517_s14 = smov 128   ;;  %s682_s0 = inlined_call_operand.hbm [shape: f32[3,16,128], index: 0, kind: input, shape index: {}]   ;;  %s683_s1 = inlined_call_operand.vmem [shape: f32[2,128], index: 1, kind: input, shape index: {}]   ;;  %s684_s2 = inlined_call_operand.vmem [shape: f32[2,128], index: 2, kind: output, shape index: {}]  }
   0x1   :  { %s12_s11 = sshll.u32 %s682_s0, 4  ;;  %s14_s13 = sshll.u32 %s516_s12, 4  ;;  %s13_s11 = int_to_ptr.hbm [resolvable:$true] %s12_s11  ;;  %s15_s13 = int_to_ptr.vmem [resolvable:$true] %s14_s13 }
   0x2   :  { %s518_s15 = smov 8  }
   0x3   :  { %20 = dma.hbm_to_vmem [thread:$0]  %s13_s11, 768, %s15_s13, [#allocation3], %s517_s14, %s517_s14, %s518_s15  }
   0x4   :  { %514 = dma.done.wait [#allocation3], 768  }
   0x5   :  { %515 = vsyncadd [#allocation3], 4294966528  ;;  %v519_v0 = vmov 16   ;;  %v520_v1 = vmov 1   ;;  %v521_v2 = vmov 0   ;;  %v27_v3 = vld [vmem:[#allocation2] sm:$0xff] }
   0x6   :  { %438 = vset.pattern.permute.xlu2 %v519_v0  ;;  %437 = vset.pattern.permute.xlu1 %v520_v1  ;;  %v28_v4 = vld [vmem:[#allocation2 + $0x8] sm:$0xff]  ;;  %v557_v5 = vld [vmem:[#allocation2 + $0x10] sm:$0xff]  ;;  %v559_v6 = vld [vmem:[#allocation2 + $0x18] sm:$0xff]  ;;  %v522_v7 = vmov 2   ;;  %v523_v8 = vmov 4   ;;  %v524_v9 = vmov 3  }
   0x7   :  { %436 = vset.pattern.permute.xlu0 %v521_v2  ;;  %62 = vperm.xlu2 %438, %v27_v3   ;;  %v525_v10 = vmov 6   ;;  %v526_v11 = vmov 5   ;;  %v527_v12 = vmov 9   ;;  %v528_v13 = vmov 11   ;;  %v604_v19 = vld [vmem:[#allocation2 + $0x20] sm:$0x3] }
   0x8   :  { %49 = vperm.xlu1 %437, %v27_v3   ;;  %37 = vperm.xlu0 %436, %v27_v3   ;;  %v529_v14 = vmov 7   ;;  %v530_v15 = vmov 14   ;;  %v531_v16 = vmov 8   ;;  %v532_v17 = vmov 10   ;;  %v34_v23 = vld [vmem:[%s683_s1] sm:$0x3] }
   0x9   :  { %v533_v21 = vmov 12   ;;  %v534_v24 = vmov 13   ;;  %v56_v25 = vperm.slane %v34_v23, 1  ;;  %v45_v26 = vperm.slane %v34_v23, 0 }
   0xa   :  { %v535_v33 = vmov 15  }
   0xf   :  { %66 = vperm.xlu2 %438, %v28_v4  }
  0x10   :  { %53 = vperm.xlu1 %437, %v28_v4   ;;  %42 = vperm.xlu0 %436, %v28_v4  }
  0x17   :  { %440 = vset.pattern.permute.xlu2 %v520_v1 }
  0x18   :  { %439 = vset.pattern.permute.xlu1 %v521_v2  ;;  %75 = vperm.xlu0 %436, %v557_v5  }
  0x19   :  { %87 = vperm.xlu2 %440, %v557_v5   ;;  %80 = vperm.xlu1 %439, %v559_v6  }
  0x20   :  { %441 = vset.pattern.permute.xlu0 %v520_v1 }
  0x21   :  { %443 = vset.pattern.permute.xlu2 %v522_v7  ;;  %442 = vset.pattern.permute.xlu1 %v522_v7 }
  0x22   :  { %91 = vperm.xlu0 %441, %v559_v6   ;;  %104 = vperm.xlu2 %443, %v559_v6  }
  0x23   :  { %100 = vperm.xlu1 %442, %v557_v5  }
  0x2a   :  { %446 = vset.pattern.permute.xlu0 %v523_v8  ;;  %445 = vset.pattern.permute.xlu2 %v524_v9 }
  0x2b   :  { %444 = vset.pattern.permute.xlu1 %v524_v9  ;;  %126 = vperm.xlu0 %446, %v557_v5  }
  0x2c   :  { %117 = vperm.xlu2 %445, %v559_v6   ;;  %113 = vperm.xlu1 %444, %v557_v5  }
  0x33   :  { %451 = vset.pattern.permute.xlu0 %v525_v10 }
  0x34   :  { %448 = vset.pattern.permute.xlu2 %v526_v11  ;;  %447 = vset.pattern.permute.xlu1 %v523_v8 }
  0x35   :  { %156 = vperm.xlu0 %451, %v559_v6   ;;  %139 = vperm.xlu2 %448, %v557_v5  }
  0x36   :  { %130 = vperm.xlu1 %447, %v559_v6  }
  0x3d   :  { %456 = vset.pattern.permute.xlu0 %v527_v12  ;;  %450 = vset.pattern.permute.xlu2 %v525_v10 }
  0x3e   :  { %449 = vset.pattern.permute.xlu1 %v526_v11  ;;  %191 = vperm.xlu0 %456, %v557_v5  }
  0x3f   :  { %152 = vperm.xlu2 %450, %v557_v5   ;;  %143 = vperm.xlu1 %449, %v559_v6  }
  0x46   :  { %461 = vset.pattern.permute.xlu0 %v528_v13 }
  0x47   :  { %453 = vset.pattern.permute.xlu2 %v529_v14  ;;  %452 = vset.pattern.permute.xlu1 %v529_v14 }
  0x48   :  { %221 = vperm.xlu0 %461, %v559_v6   ;;  %169 = vperm.xlu2 %453, %v559_v6  }
  0x49   :  { %165 = vperm.xlu1 %452, %v557_v5  }
  0x50   :  { %466 = vset.pattern.permute.xlu0 %v530_v15  ;;  %455 = vset.pattern.permute.xlu2 %v531_v16 }
  0x51   :  { %454 = vset.pattern.permute.xlu1 %v531_v16  ;;  %256 = vperm.xlu0 %466, %v557_v5  }
  0x52   :  { %182 = vperm.xlu2 %455, %v559_v6   ;;  %178 = vperm.xlu1 %454, %v557_v5  }
  0x59   :  { %471 = vset.pattern.permute.xlu0 %v519_v0 }
  0x5a   :  { %458 = vset.pattern.permute.xlu2 %v532_v17  ;;  %457 = vset.pattern.permute.xlu1 %v527_v12 }
  0x5b   :  { %204 = vperm.xlu2 %458, %v557_v5   ;;  %195 = vperm.xlu1 %457, %v559_v6  }
  0x5c   :  { %286 = vperm.xlu0 %471, %v559_v6  }
  0x61   :  { %v63_v18 = vpop.permute.xlu2 %62 }
  0x63   :  { %460 = vset.pattern.permute.xlu2 %v528_v13  ;;  %459 = vset.pattern.permute.xlu1 %v532_v17 }
  0x64   :  { %217 = vperm.xlu2 %460, %v557_v5   ;;  %208 = vperm.xlu1 %459, %v559_v6  }
  0x65   :  { %476 = vset.pattern.permute.xlu0 %v523_v8 }
  0x66   :  { %322 = vperm.xlu0 %476, %v604_v19  }
  0x69   :  { %v67_v20 = vpop.permute.xlu2 %66 }
  0x6c   :  { %463 = vset.pattern.permute.xlu2 %v533_v21  ;;  %462 = vset.pattern.permute.xlu1 %v533_v21 }
  0x6d   :  { %234 = vperm.xlu2 %463, %v559_v6   ;;  %230 = vperm.xlu1 %462, %v557_v5  }
  0x6e   :  { %481 = vset.pattern.permute.xlu0 %v527_v12 }
  0x6f   :  { %357 = vperm.xlu0 %481, %v604_v19  }
  0x73   :  { %v88_v22 = vpop.permute.xlu2 %87 }
  0x75   :  { %465 = vset.pattern.permute.xlu2 %v534_v24  ;;  %464 = vset.pattern.permute.xlu1 %v534_v24 }
  0x76   :  { %247 = vperm.xlu2 %465, %v559_v6   ;;  %243 = vperm.xlu1 %464, %v557_v5  }
  0x77   :  { %486 = vset.pattern.permute.xlu0 %v530_v15 }
  0x78   :  { %392 = vperm.xlu0 %486, %v604_v19  }
  0x7a   :  { %v50_v27 = vpop.permute.xlu1 %49  ;;  %v38_v29 = vpop.permute.xlu0 %37 }
  0x7b   :  { %v57_v28 = vmul.f32 %v56_v25, %v50_v27  ;;  %v46_v30 = vmul.f32 %v45_v26, %v38_v29 }
  0x7c   :  { %v105_v31 = vpop.permute.xlu2 %104 }
  0x7d   :  { %v59_v32 = vadd.f32 %v57_v28, %v46_v30 }
  0x7e   :  { %468 = vset.pattern.permute.xlu2 %v535_v33  ;;  %467 = vset.pattern.permute.xlu1 %v530_v15 }
  0x7f   :  { %269 = vperm.xlu2 %468, %v557_v5   ;;  %v69_v34 = vadd.f32 %v63_v18, %v59_v32  ;;  %260 = vperm.xlu1 %467, %v559_v6  }
  0x80   :  { %489 = vset.pattern.permute.xlu0 %v519_v0 }
  0x81   :  { %v627_v35 = vmax.f32 %v69_v34, 0.0 }
  0x82   :  { %v54_v36 = vpop.permute.xlu1 %53  ;;  %v43_v38 = vpop.permute.xlu0 %42 }
  0x83   :  { %v58_v37 = vmul.f32 %v56_v25, %v54_v36  ;;  %v107_v39 = vperm.slane %v627_v35, 2  ;;  %v47_v40 = vmul.f32 %v45_v26, %v43_v38  ;;  %v120_v41 = vperm.slane %v627_v35, 3 }
  0x84   :  { %v94_v42 = vperm.slane %v627_v35, 1  ;;  %v83_v49 = vperm.slane %v627_v35, 0  ;;  %v146_v55 = vperm.slane %v627_v35, 5  ;;  %v172_v18 = vperm.slane %v627_v35, 7 }
  0x85   :  { %v109_v43 = vmul.f32 %v107_v39, %v105_v31  ;;  %v60_v44 = vadd.f32 %v58_v37, %v47_v40 }
  0x86   :  { %v118_v45 = vpop.permute.xlu2 %117  ;;  %v95_v47 = vmul.f32 %v94_v42, %v88_v22 }
  0x87   :  { %470 = vset.pattern.permute.xlu2 %v519_v0  ;;  %v122_v46 = vmul.f32 %v120_v41, %v118_v45  ;;  %v70_v48 = vadd.f32 %v67_v20, %v60_v44  ;;  %469 = vset.pattern.permute.xlu1 %v535_v33 }
  0x88   :  { %282 = vperm.xlu2 %470, %v557_v5   ;;  %273 = vperm.xlu1 %469, %v559_v6   ;;  %v133_v6 = vperm.slane %v627_v35, 4 }
  0x89   :  { %v657_v30 = vmax.f32 %v70_v48, 0.0 }
  0x8a   :  { %v76_v50 = vpop.permute.xlu0 %75 }
  0x8b   :  { %v84_v51 = vmul.f32 %v83_v49, %v76_v50  ;;  %v81_v52 = vpop.permute.xlu1 %80  ;;  %v224_v48 = vperm.slane %v657_v30, 3 }
  0x8c   :  { %v85_v53 = vmul.f32 %v83_v49, %v81_v52 }
  0x8d   :  { %v97_v54 = vadd.f32 %v95_v47, %v84_v51 }
  0x8f   :  { %v140_v56 = vpop.permute.xlu2 %139 }
  0x90   :  { %473 = vset.pattern.permute.xlu2 %v520_v1  ;;  %472 = vset.pattern.permute.xlu1 %v521_v2  ;;  %v147_v57 = vmul.f32 %v146_v55, %v140_v56 }
  0x91   :  { %301 = vperm.xlu2 %473, %v604_v19   ;;  %295 = vperm.xlu1 %472, %v604_v19  }
  0x94   :  { %v92_v58 = vpop.permute.xlu0 %91 }
  0x95   :  { %v96_v59 = vmul.f32 %v94_v42, %v92_v58  ;;  %v101_v60 = vpop.permute.xlu1 %100 }
  0x96   :  { %v108_v61 = vmul.f32 %v107_v39, %v101_v60 }
  0x97   :  { %v98_v62 = vadd.f32 %v96_v59, %v85_v53  ;;  %v237_v59 = vperm.slane %v657_v30, 4 }
  0x98   :  { %v110_v63 = vadd.f32 %v108_v61, %v97_v54 }
  0x99   :  { %v111_v3 = vadd.f32 %v109_v43, %v98_v62  ;;  %475 = vset.pattern.permute.xlu2 %v524_v9  ;;  %v153_v4 = vpop.permute.xlu2 %152  ;;  %474 = vset.pattern.permute.xlu1 %v522_v7  ;;  %v159_v9 = vperm.slane %v627_v35, 6  ;;  %v198_v43 = vperm.slane %v657_v30, 1  ;;  %v250_v62 = vperm.slane %v657_v30, 5 }
  0x9a   :  { %315 = vperm.xlu2 %475, %v604_v19   ;;  %308 = vperm.xlu1 %474, %v604_v19  }
  0x9b   :  { %v124_v1 = vadd.f32 %v122_v46, %v111_v3  ;;  %v160_v23 = vmul.f32 %v159_v9, %v153_v4  ;;  %v211_v46 = vperm.slane %v657_v30, 2 }
  0x9d   :  { %v127_v2 = vpop.permute.xlu0 %126 }
  0x9e   :  { %v114_v5 = vpop.permute.xlu1 %113  ;;  %v134_v12 = vmul.f32 %v133_v6, %v127_v2 }
  0x9f   :  { %v121_v8 = vmul.f32 %v120_v41, %v114_v5 }
  0xa1   :  { %v123_v15 = vadd.f32 %v121_v8, %v110_v63 }
  0xa2   :  { %478 = vset.pattern.permute.xlu2 %v525_v10  ;;  %477 = vset.pattern.permute.xlu1 %v526_v11  ;;  %v170_v7 = vpop.permute.xlu2 %169 }
  0xa3   :  { %336 = vperm.xlu2 %478, %v604_v19   ;;  %v136_v20 = vadd.f32 %v134_v12, %v123_v15  ;;  %v174_v22 = vmul.f32 %v172_v18, %v170_v7  ;;  %329 = vperm.xlu1 %477, %v604_v19   ;;  %v263_v15 = vperm.slane %v657_v30, 6 }
  0xa5   :  { %v149_v25 = vadd.f32 %v147_v57, %v136_v20  ;;  %v276_v20 = vperm.slane %v657_v30, 7 }
  0xa7   :  { %v162_v27 = vadd.f32 %v160_v23, %v149_v25  ;;  %v157_v10 = vpop.permute.xlu0 %156 }
  0xa8   :  { %v131_v26 = vpop.permute.xlu1 %130  ;;  %v161_v34 = vmul.f32 %v159_v9, %v157_v10 }
  0xa9   :  { %v135_v28 = vmul.f32 %v133_v6, %v131_v26 }
  0xab   :  { %v137_v29 = vadd.f32 %v135_v28, %v124_v1  ;;  %480 = vset.pattern.permute.xlu2 %v531_v16  ;;  %479 = vset.pattern.permute.xlu1 %v529_v14  ;;  %v185_v14 = vperm.slane %v657_v30, 0 }
  0xac   :  { %350 = vperm.xlu2 %480, %v604_v19   ;;  %343 = vperm.xlu1 %479, %v604_v19   ;;  %v183_v31 = vpop.permute.xlu2 %182 }
  0xad   :  { %v187_v36 = vmul.f32 %v185_v14, %v183_v31 }
  0xb1   :  { %v144_v11 = vpop.permute.xlu1 %143 }
  0xb2   :  { %v148_v32 = vmul.f32 %v146_v55, %v144_v11 }
  0xb4   :  { %483 = vset.pattern.permute.xlu2 %v528_v13  ;;  %v150_v35 = vadd.f32 %v148_v32, %v137_v29  ;;  %482 = vset.pattern.permute.xlu1 %v532_v17  ;;  %v192_v17 = vpop.permute.xlu0 %191 }
  0xb5   :  { %371 = vperm.xlu2 %483, %v604_v19   ;;  %364 = vperm.xlu1 %482, %v604_v19   ;;  %v205_v41 = vpop.permute.xlu2 %204 }
  0xb6   :  { %v163_v16 = vadd.f32 %v161_v34, %v150_v35  ;;  %v212_v47 = vmul.f32 %v211_v46, %v205_v41 }
  0xb8   :  { %v176_v37 = vadd.f32 %v174_v22, %v163_v16 }
  0xba   :  { %v189_v39 = vadd.f32 %v187_v36, %v176_v37 }
  0xbb   :  { %v166_v38 = vpop.permute.xlu1 %165 }
  0xbc   :  { %v173_v40 = vmul.f32 %v172_v18, %v166_v38 }
  0xbd   :  { %485 = vset.pattern.permute.xlu2 %v534_v24  ;;  %484 = vset.pattern.permute.xlu1 %v533_v21  ;;  %v199_v24 = vmul.f32 %v198_v43, %v192_v17 }
  0xbe   :  { %v175_v13 = vadd.f32 %v173_v40, %v162_v27  ;;  %385 = vperm.xlu2 %485, %v604_v19   ;;  %378 = vperm.xlu1 %484, %v604_v19   ;;  %v218_v45 = vpop.permute.xlu2 %217 }
  0xbf   :  { %v225_v50 = vmul.f32 %v224_v48, %v218_v45 }
  0xc4   :  { %v179_v42 = vpop.permute.xlu1 %178 }
  0xc5   :  { %v186_v44 = vmul.f32 %v185_v14, %v179_v42 }
  0xc6   :  { %488 = vset.pattern.permute.xlu2 %v519_v0  ;;  %487 = vset.pattern.permute.xlu1 %v535_v33  ;;  %v222_v33 = vpop.permute.xlu0 %221 }
  0xc7   :  { %406 = vperm.xlu2 %488, %v604_v19   ;;  %v188_v21 = vadd.f32 %v186_v44, %v175_v13  ;;  %399 = vperm.xlu1 %487, %v604_v19   ;;  %v235_v54 = vpop.permute.xlu2 %234  ;;  %v226_v58 = vmul.f32 %v224_v48, %v222_v33 }
  0xc8   :  { %v239_v19 = vmul.f32 %v237_v59, %v235_v54 }
  0xc9   :  { %v201_v49 = vadd.f32 %v199_v24, %v188_v21 }
  0xcb   :  { %v214_v51 = vadd.f32 %v212_v47, %v201_v49 }
  0xcd   :  { %v196_v52 = vpop.permute.xlu1 %195  ;;  %v227_v53 = vadd.f32 %v225_v50, %v214_v51 }
  0xce   :  { %v200_v0 = vmul.f32 %v198_v43, %v196_v52  ;;  %v257_v8 = vpop.permute.xlu0 %256 }
  0xcf   :  { %v264_v9 = vmul.f32 %v263_v15, %v257_v8 }
  0xd0   :  { %v202_v55 = vadd.f32 %v200_v0, %v189_v39  ;;  %v248_v61 = vpop.permute.xlu2 %247 }
  0xd1   :  { %v252_v3 = vmul.f32 %v250_v62, %v248_v61 }
  0xd6   :  { %v209_v56 = vpop.permute.xlu1 %208  ;;  %v287_v40 = vpop.permute.xlu0 %286 }
  0xd7   :  { %v213_v57 = vmul.f32 %v211_v46, %v209_v56 }
  0xd9   :  { %v215_v60 = vadd.f32 %v213_v57, %v202_v55  ;;  %v270_v7 = vpop.permute.xlu2 %269 }
  0xda   :  { %v277_v23 = vmul.f32 %v276_v20, %v270_v7 }
  0xdb   :  { %v228_v63 = vadd.f32 %v226_v58, %v215_v60 }
  0xdd   :  { %v241_v4 = vadd.f32 %v239_v19, %v228_v63 }
  0xde   :  { %v323_v49 = vpop.permute.xlu0 %322 }
  0xdf   :  { %v231_v1 = vpop.permute.xlu1 %230  ;;  %v254_v2 = vadd.f32 %v252_v3, %v241_v4 }
  0xe0   :  { %v238_v5 = vmul.f32 %v237_v59, %v231_v1 }
  0xe2   :  { %v240_v6 = vadd.f32 %v238_v5, %v227_v53  ;;  %v283_v29 = vpop.permute.xlu2 %282 }
  0xe6   :  { %v358_v3 = vpop.permute.xlu0 %357 }
  0xe8   :  { %v244_v12 = vpop.permute.xlu1 %243 }
  0xe9   :  { %v251_v18 = vmul.f32 %v250_v62, %v244_v12 }
  0xeb   :  { %v253_v22 = vadd.f32 %v251_v18, %v240_v6  ;;  %v302_v34 = vpop.permute.xlu2 %301 }
  0xed   :  { %v266_v25 = vadd.f32 %v264_v9, %v253_v22 }
  0xef   :  { %v279_v26 = vadd.f32 %v277_v23, %v266_v25 }
  0xf1   :  { %v261_v27 = vpop.permute.xlu1 %260  ;;  %v289_v35 = vadd.f32 %v283_v29, %v279_v26 }
  0xf2   :  { %v265_v28 = vmul.f32 %v263_v15, %v261_v27 }
  0xf3   :  { %v291_v16 = vmax.f32 %v289_v35, 0.0 }
  0xf4   :  { %v267_v10 = vadd.f32 %v265_v28, %v254_v2  ;;  %v316_v36 = vpop.permute.xlu2 %315  ;;  %v393_v28 = vpop.permute.xlu0 %392 }
  0xf5   :  { %v304_v37 = vperm.slane %v291_v16, 1  ;;  %v298_v38 = vperm.slane %v291_v16, 0  ;;  %v311_v30 = vperm.slane %v291_v16, 2  ;;  %v318_v42 = vperm.slane %v291_v16, 3 }
  0xf6   :  { %v325_v24 = vperm.slane %v291_v16, 4  ;;  %v332_v48 = vperm.slane %v291_v16, 5  ;;  %v339_v54 = vperm.slane %v291_v16, 6  ;;  %v346_v57 = vperm.slane %v291_v16, 7 }
  0xf7   :  { %v305_v13 = vmul.f32 %v304_v37, %v302_v34  ;;  %v319_v46 = vmul.f32 %v318_v42, %v316_v36 }
  0xf8   :  { %v326_v50 = vmul.f32 %v325_v24, %v323_v49 }
  0xfa   :  { %v274_v11 = vpop.permute.xlu1 %273 }
  0xfb   :  { %v278_v31 = vmul.f32 %v276_v20, %v274_v11 }
  0xfd   :  { %v280_v32 = vadd.f32 %v278_v31, %v267_v10  ;;  %v337_v45 = vpop.permute.xlu2 %336 }
  0xfe   :  { %v340_v56 = vmul.f32 %v339_v54, %v337_v45 }
  0xff   :  { %v290_v51 = vadd.f32 %v287_v40, %v280_v32 }
 0x101   :  { %v292_v0 = vmax.f32 %v290_v51, 0.0 }
 0x103   :  { %v296_v14 = vpop.permute.xlu1 %295  ;;  %v360_v59 = vperm.slane %v292_v0, 1  ;;  %v353_v60 = vperm.slane %v292_v0, 0  ;;  %v367_v6 = vperm.slane %v292_v0, 2  ;;  %v374_v12 = vperm.slane %v292_v0, 3 }
 0x104   :  { %v299_v39 = vmul.f32 %v298_v38, %v296_v14  ;;  %v381_v20 = vperm.slane %v292_v0, 4  ;;  %v395_v25 = vperm.slane %v292_v0, 6  ;;  %v388_v26 = vperm.slane %v292_v0, 5 }
 0x105   :  { %v361_v4 = vmul.f32 %v360_v59, %v358_v3  ;;  %v402_v34 = vperm.slane %v292_v0, 7 }
 0x106   :  { %v306_v43 = vadd.f32 %v305_v13, %v299_v39  ;;  %v351_v33 = vpop.permute.xlu2 %350  ;;  %v396_v11 = vmul.f32 %v395_v25, %v393_v28 }
 0x107   :  { %v354_v62 = vmul.f32 %v353_v60, %v351_v33 }
 0x10c   :  { %v309_v41 = vpop.permute.xlu1 %308 }
 0x10d   :  { %v312_v17 = vmul.f32 %v311_v30, %v309_v41 }
 0x10f   :  { %v313_v44 = vadd.f32 %v312_v17, %v306_v43  ;;  %v372_v5 = vpop.permute.xlu2 %371 }
 0x110   :  { %v375_v18 = vmul.f32 %v374_v12, %v372_v5 }
 0x111   :  { %v320_v21 = vadd.f32 %v319_v46, %v313_v44 }
 0x113   :  { %v327_v53 = vadd.f32 %v326_v50, %v320_v21 }
 0x115   :  { %v330_v47 = vpop.permute.xlu1 %329 }
 0x116   :  { %v333_v52 = vmul.f32 %v332_v48, %v330_v47 }
 0x118   :  { %v334_v55 = vadd.f32 %v333_v52, %v327_v53  ;;  %v386_v22 = vpop.permute.xlu2 %385 }
 0x119   :  { %v389_v29 = vmul.f32 %v388_v26, %v386_v22 }
 0x11a   :  { %v341_v61 = vadd.f32 %v340_v56, %v334_v55 }
 0x11e   :  { %v344_v58 = vpop.permute.xlu1 %343 }
 0x11f   :  { %v347_v19 = vmul.f32 %v346_v57, %v344_v58 }
 0x121   :  { %v348_v63 = vadd.f32 %v347_v19, %v341_v61  ;;  %v407_v16 = vpop.permute.xlu2 %406 }
 0x123   :  { %v355_v1 = vadd.f32 %v354_v62, %v348_v63 }
 0x125   :  { %v362_v2 = vadd.f32 %v361_v4, %v355_v1 }
 0x127   :  { %v365_v8 = vpop.permute.xlu1 %364 }
 0x128   :  { %v368_v15 = vmul.f32 %v367_v6, %v365_v8 }
 0x12a   :  { %v369_v7 = vadd.f32 %v368_v15, %v362_v2 }
 0x12c   :  { %v376_v9 = vadd.f32 %v375_v18, %v369_v7 }
 0x130   :  { %v379_v23 = vpop.permute.xlu1 %378 }
 0x131   :  { %v382_v27 = vmul.f32 %v381_v20, %v379_v23 }
 0x133   :  { %v383_v10 = vadd.f32 %v382_v27, %v376_v9 }
 0x135   :  { %v390_v31 = vadd.f32 %v389_v29, %v383_v10 }
 0x137   :  { %v397_v32 = vadd.f32 %v396_v11, %v390_v31 }
 0x139   :  { %v400_v35 = vpop.permute.xlu1 %399 }
 0x13a   :  { %v403_v14 = vmul.f32 %v402_v34, %v400_v35 }
 0x13c   :  { %v404_v36 = vadd.f32 %v403_v14, %v397_v32 }
 0x13e   :  { %v409_v37 = vadd.f32 %v407_v16, %v404_v36 }
 0x140   :  { %410 = vst [vmem:[%s684_s2] sm:$0x3] %v409_v37 }
 0x141   :  { %415 = vsyncpa [#allocation3], 1 }

</bundles_post_ra>
